<compile_context>
chip_gen: v5e
topology: v5e:2x2
jax: 0.10.0
libtpu: 0.0.40
codegen_flags: <defaults>
</compile_context>

<pallas_src>
import math

import jax
import jax.numpy as jnp
from jax.experimental import pallas as pl
from jax.experimental.pallas import tpu as pltpu


# ---------------------------------------------------------------------------
# Kernels
# ---------------------------------------------------------------------------

def _ffn_resident_kernel(x_ref, w1_ref, b1_ref, w2_ref, b2_ref, o_ref):
    """Weight-resident path: W1/W2/b1/b2 stay in VMEM across all row tiles."""
    d_ff = w1_ref.shape[1]
    chunk = 256 if (d_ff % 256 == 0 and d_ff > 256) else d_ff
    acc = jnp.broadcast_to(b2_ref[...].astype(jnp.float32), o_ref.shape)
    for c in range(d_ff // chunk):
        lo, hi = c * chunk, (c + 1) * chunk
        h = jnp.dot(x_ref[...], w1_ref[:, lo:hi],
                    preferred_element_type=jnp.float32)
        h = jnp.maximum(h + b1_ref[:, lo:hi].astype(jnp.float32), 0.0)
        # Dropout == identity (eval mode).
        acc = acc + jnp.dot(h.astype(w2_ref.dtype), w2_ref[lo:hi, :],
                            preferred_element_type=jnp.float32)
    o_ref[...] = acc.astype(o_ref.dtype)


def _ffn_stream_kernel(x_ref, w1_ref, b1_ref, w2_ref, b2_ref, o_ref, acc_ref):
    """Weight-streaming path: d_ff is K-tiled (grid axis 1, 'arbitrary')."""
    k = pl.program_id(1)

    @pl.when(k == 0)
    def _init():
        # Fold b2 into the accumulator once per row tile.
        acc_ref[...] = jnp.broadcast_to(
            b2_ref[...].astype(jnp.float32), acc_ref.shape)

    tf = w1_ref.shape[1]
    chunk = 256 if (tf % 256 == 0 and tf > 256) else tf
    acc = acc_ref[...]
    for c in range(tf // chunk):
        lo, hi = c * chunk, (c + 1) * chunk
        h = jnp.dot(x_ref[...], w1_ref[:, lo:hi],
                    preferred_element_type=jnp.float32)
        h = jnp.maximum(h + b1_ref[:, lo:hi].astype(jnp.float32), 0.0)
        # Dropout == identity (eval mode).
        acc = acc + jnp.dot(h.astype(w2_ref.dtype), w2_ref[lo:hi, :],
                            preferred_element_type=jnp.float32)
    acc_ref[...] = acc

    @pl.when(k == pl.num_programs(1) - 1)
    def _finalize():
        o_ref[...] = acc_ref[...].astype(o_ref.dtype)


# ---------------------------------------------------------------------------
# Tile / budget selection helpers
# ---------------------------------------------------------------------------

def _round_up(x, m):
    return ((x + m - 1) // m) * m


def _vmem_budget_bytes():
    """~3/4 of per-core physical VMEM (48 MiB on v7x, 96 MiB on v5e/v6e).

    Never request full physical VMEM: leave headroom for compiler-internal
    scratch, semaphores, and the f32 staging buffers.
    """
    phys = None
    try:
        info = pltpu.get_tpu_info()
        for name in ("vmem_capacity_bytes", "vmem_size_bytes", "vmem_bytes"):
            v = getattr(info, name, None)
            if isinstance(v, int) and v > 0:
                phys = v
                break
    except Exception:
        phys = None
    if not phys:
        phys = 64 * 1024 * 1024  # most conservative (v7x per-TC VMEM)
    return (phys * 3) // 4


def _pick_tf(d_ff, target):
    """d_ff K-tile: full if small, else a 256-aligned divisor <= target, else
    pad d_ff and use 256.  Never below 256 (the MXU is 256 wide on v6e/v7x)."""
    if d_ff <= target:
        return d_ff, d_ff
    for cand in (target, 1024, 512, 256):
        if cand <= target and d_ff % cand == 0:
            return cand, d_ff
    # No aligned divisor: pad d_ff with zero weights to a multiple of 256.
    return 256, _round_up(d_ff, 256)


def _pick_tm(rows, sub, fits):
    """Row tile: as large as the VMEM budget allows (primary intensity knob),
    multiples of 256 preferred (fills the v6e/v7x MXU), aligned to the dtype
    sublane packing, preferring >=2 row tiles so both v7x TensorCores work."""
    rows_al = _round_up(rows, sub)
    if rows_al <= 256:
        return rows_al
    cands = [c for c in (1024, 768, 512, 256, 128)
             if c % sub == 0 and c <= rows_al and fits(c)]
    if not cands:
        return 128
    n_tiles = lambda c: -(-rows_al // c)
    multi = [c for c in cands if n_tiles(c) >= 2]
    pool = multi if multi else cands
    # Fewest row tiles (fewest weight (re)streams), then least row padding.
    return min(pool, key=lambda c: (n_tiles(c), _round_up(rows, c) - rows, -c))


# ---------------------------------------------------------------------------
# Public wrapper
# ---------------------------------------------------------------------------

def feed_forward_block(x, w1, b1, w2, b2, *, tile_rows=None, tile_ff=None,
                       force_streaming=False):
    """x: (batch, seq, d_model). w1: (d_model, d_ff), w2: (d_ff, d_model)."""
    batch, seq, d_model = x.shape
    d_ff = w1.shape[1]
    rows = batch * seq

    in_bytes = x.dtype.itemsize
    w_bytes = w1.dtype.itemsize
    out_bytes = in_bytes
    sub = max(8, 32 // in_bytes)        # sublane packing: f32->8, bf16->16, i8->32

    vmem_limit = _vmem_budget_bytes()
    fit_budget = int(vmem_limit * 0.9)  # keep slack inside the requested limit

    if tile_ff is None:
        # Bigger K tiles cut per-grid-step overhead; affordable on v5e/v6e's
        # 128 MiB VMEM, keep 512 on v7x's 64 MiB.
        tile_ff = 1024 if vmem_limit >= 80 * 1024 * 1024 else 512

    x2d = x.reshape(rows, d_model)
    b1_2d = b1.reshape(1, d_ff)
    b2_2d = b2.reshape(1, d_model)

    # ------------------- weight-resident fast path --------------------------
    resident_w_bytes = (2 * d_model * d_ff + d_ff + d_model) * w_bytes

    def resident_fits(tm_):
        chunk = 256 if (d_ff % 256 == 0 and d_ff > 256) else d_ff
        act = 2 * tm_ * d_model * (in_bytes + out_bytes)   # x/out double buffers
        f32 = tm_ * d_model * 4 + tm_ * chunk * 4          # f32 acc + ReLU staging
        return resident_w_bytes + act + f32 <= fit_budget

    use_resident = (not force_streaming) and resident_fits(
        min(_round_up(rows, sub), 128))

    if use_resident:
        if tile_rows is not None:
            tm = _round_up(min(tile_rows, _round_up(rows, sub)), sub)
        else:
            tm = _pick_tm(rows, sub, resident_fits)
        rows_p = _round_up(rows, tm)
        if rows_p != rows:
            x2d = jnp.pad(x2d, ((0, rows_p - rows), (0, 0)))

        out2d = pl.pallas_call(
            _ffn_resident_kernel,
            out_shape=jax.ShapeDtypeStruct((rows_p, d_model), x.dtype),
            grid_spec=pltpu.PrefetchScalarGridSpec(
                num_scalar_prefetch=0,
                grid=(rows_p // tm,),
                in_specs=[
                    pl.BlockSpec((tm, d_model), lambda i: (i, 0)),    # x row tile
                    pl.BlockSpec((d_model, d_ff), lambda i: (0, 0)),  # W1 resident
                    pl.BlockSpec((1, d_ff), lambda i: (0, 0)),        # b1 resident
                    pl.BlockSpec((d_ff, d_model), lambda i: (0, 0)),  # W2 resident
                    pl.BlockSpec((1, d_model), lambda i: (0, 0)),     # b2 resident
                ],
                out_specs=pl.BlockSpec((tm, d_model), lambda i: (i, 0)),
            ),
            compiler_params=pltpu.CompilerParams(
                dimension_semantics=("parallel",),
                vmem_limit_bytes=vmem_limit,
            ),
        )(x2d, w1, b1_2d, w2, b2_2d)
        return out2d[:rows].reshape(batch, seq, d_model)

    # ------------------- weight-streaming (K-tiled) path ---------------------
    tf, d_ff_p = _pick_tf(d_ff, tile_ff)
    if d_ff_p != d_ff:
        # Zero-pad d_ff: relu(x@0 + 0) = 0 and 0-rows of W2 contribute nothing.
        w1 = jnp.pad(w1, ((0, 0), (0, d_ff_p - d_ff)))
        b1_2d = jnp.pad(b1_2d, ((0, 0), (0, d_ff_p - d_ff)))
        w2 = jnp.pad(w2, ((0, d_ff_p - d_ff), (0, 0)))

    def stream_fits(tm_):
        chunk = 256 if (tf % 256 == 0 and tf > 256) else tf
        act = 2 * tm_ * d_model * (in_bytes + out_bytes)       # x/out double buffers
        wgt = 2 * (2 * d_model * tf + tf + d_model) * w_bytes  # W1/W2/b tiles x2
        f32 = tm_ * d_model * 4 + tm_ * chunk * 4              # acc scratch + staging
        return act + wgt + f32 <= fit_budget

    if tile_rows is not None:
        tm = _round_up(min(tile_rows, _round_up(rows, sub)), sub)
    else:
        tm = _pick_tm(rows, sub, stream_fits)
    # Very large d_model (e.g. 8192) on v7x: shrink the K tile before the rows.
    if not stream_fits(tm) and tf > 256 and d_ff_p % 256 == 0:
        tf = 256
        if tile_rows is None:
            tm = _pick_tm(rows, sub, stream_fits)

    rows_p = _round_up(rows, tm)
    if rows_p != rows:
        x2d = jnp.pad(x2d, ((0, rows_p - rows), (0, 0)))

    # TODO(synk): consider pipeline_mode=pl.Buffered(3) on the W1/W2 specs when
    # the VMEM budget allows (hides HBM jitter / v7x dual-TC contention).
    out2d = pl.pallas_call(
        _ffn_stream_kernel,
        out_shape=jax.ShapeDtypeStruct((rows_p, d_model), x.dtype),
        grid_spec=pltpu.PrefetchScalarGridSpec(
            num_scalar_prefetch=0,
            grid=(rows_p // tm, d_ff_p // tf),
            in_specs=[
                pl.BlockSpec((tm, d_model), lambda i, k: (i, 0)),   # x row tile
                pl.BlockSpec((d_model, tf), lambda i, k: (0, k)),   # W1 K-tile
                pl.BlockSpec((1, tf), lambda i, k: (0, k)),         # b1 K-tile
                pl.BlockSpec((tf, d_model), lambda i, k: (k, 0)),   # W2 K-tile
                pl.BlockSpec((1, d_model), lambda i, k: (0, 0)),    # b2
            ],
            out_specs=pl.BlockSpec((tm, d_model), lambda i, k: (i, 0)),
            scratch_shapes=[pltpu.VMEM((tm, d_model), jnp.float32)],
        ),
        compiler_params=pltpu.CompilerParams(
            dimension_semantics=("parallel", "arbitrary"),
            vmem_limit_bytes=vmem_limit,
        ),
    )(x2d, w1, b1_2d, w2, b2_2d)
    return out2d[:rows].reshape(batch, seq, d_model)


def init_params(key, d_model, d_ff, dtype=jnp.float32):
    """Deterministic init matching nn.Linear shapes (weights stored transposed)."""
    k1, k2, k3, k4 = jax.random.split(key, 4)
    bound1 = 1.0 / math.sqrt(d_model)
    bound2 = 1.0 / math.sqrt(d_ff)
    # torch Linear weight is (out, in); we store (in, out) = W^T for x @ W + b.
    w1 = jax.random.uniform(k1, (d_model, d_ff), dtype, -bound1, bound1)
    b1 = jax.random.uniform(k2, (d_ff,), dtype, -bound1, bound1)
    w2 = jax.random.uniform(k3, (d_ff, d_model), dtype, -bound2, bound2)
    b2 = jax.random.uniform(k4, (d_model,), dtype, -bound2, bound2)
    return w1, b1, w2, b2


if __name__ == "__main__":
    key = jax.random.PRNGKey(0)
    k1, k2, k3, k4, k5, k6 = jax.random.split(key, 6)

    # ---- 1. Small f32 check (weight-resident path) --------------------------
    batch, seq, d_model, d_ff = 2, 8, 32, 64
    x = jax.random.normal(k1, (batch, seq, d_model), jnp.float32)
    w1, b1, w2, b2 = init_params(k2, d_model, d_ff)
    out = feed_forward_block(x, w1, b1, w2, b2)
    jax.block_until_ready(out)
    ref = jnp.maximum(x @ w1 + b1, 0.0) @ w2 + b2
    assert out.shape == (batch, seq, d_model)
    assert jnp.allclose(out, ref, atol=1e-4, rtol=1e-4), "f32 resident mismatch"

    # ---- 2. bf16 run: row padding + resident weights -------------------------
    bb, ss, dm2, df2 = 2, 200, 256, 1024          # rows=400 -> padded row tiles
    xb = jax.random.normal(k3, (bb, ss, dm2), jnp.float32).astype(jnp.bfloat16)
    w1b, b1b, w2b, b2b = init_params(k4, dm2, df2, dtype=jnp.bfloat16)
    outb = feed_forward_block(xb, w1b, b1b, w2b, b2b)
    jax.block_until_ready(outb)
    # Reference mimicking kernel precision (bf16 operands, f32 accumulation,
    # ReLU output cast to bf16 before the second matmul).
    xf = xb.astype(jnp.float32)
    hf = jnp.maximum(xf @ w1b.astype(jnp.float32) + b1b.astype(jnp.float32), 0.0)
    refb = (hf.astype(jnp.bfloat16).astype(jnp.float32)
            @ w2b.astype(jnp.float32) + b2b.astype(jnp.float32))
    assert outb.shape == (bb, ss, dm2)
    assert jnp.allclose(outb.astype(jnp.float32), refb, atol=2e-2, rtol=2e-2), \
        "bf16 resident mismatch"

    # ---- 3. f32 streaming path: d_ff K-tiling + d_ff zero-padding ------------
    bc, sc, dm3, df3 = 2, 100, 128, 640           # d_ff=640 -> padded to 768, tf=256
    xc = jax.random.normal(k5, (bc, sc, dm3), jnp.float32)
    w1c, b1c, w2c, b2c = init_params(k6, dm3, df3)
    outc = feed_forward_block(xc, w1c, b1c, w2c, b2c,
                              tile_ff=256, force_streaming=True)
    jax.block_until_ready(outc)
    refc = jnp.maximum(xc @ w1c + b1c, 0.0) @ w2c + b2c
    assert outc.shape == (bc, sc, dm3)
    assert jnp.allclose(outc, refc, atol=1e-4, rtol=1e-4), "f32 streaming mismatch"

    print("KERNEL_OK")
</pallas_src>

<mosaic_0001>
module attributes {stable_mosaic.version = 11 : i64} {
  func.func @_ffn_resident_kernel(%arg0: i32, %arg1: memref<16x32xf32, #tpu.memory_space<vmem>>, %arg2: memref<32x64xf32, #tpu.memory_space<vmem>>, %arg3: memref<1x64xf32, #tpu.memory_space<vmem>>, %arg4: memref<64x32xf32, #tpu.memory_space<vmem>>, %arg5: memref<1x32xf32, #tpu.memory_space<vmem>>, %arg6: memref<16x32xf32, #tpu.memory_space<vmem>>) attributes {dimension_semantics = [#tpu.dimension_semantics<parallel>], iteration_bounds = array<i64: 1>, scalar_prefetch = 0 : i64, scratch_operands = 0 : i64, tpu.core_type = #tpu.core_type<tc>, window_params = [{transform_indices = @transform_0, window_bounds = array<i64: 16, 32>}, {pipeline_mode = #tpu.pipeline_mode<synchronous>, transform_indices = @transform_1, window_bounds = array<i64: 32, 64>}, {pipeline_mode = #tpu.pipeline_mode<synchronous>, transform_indices = @transform_2, window_bounds = array<i64: 1, 64>}, {pipeline_mode = #tpu.pipeline_mode<synchronous>, transform_indices = @transform_3, window_bounds = array<i64: 64, 32>}, {pipeline_mode = #tpu.pipeline_mode<synchronous>, transform_indices = @transform_4, window_bounds = array<i64: 1, 32>}, {transform_indices = @transform_5, window_bounds = array<i64: 16, 32>}]} {
    %c0 = arith.constant 0 : index
    %c0_0 = arith.constant 0 : index
    %0 = vector.load %arg5[%c0, %c0_0] : memref<1x32xf32, #tpu.memory_space<vmem>>, vector<1x32xf32>
    %1 = vector.shape_cast %0 : vector<1x32xf32> to vector<1x32xf32>
    %2 = vector.broadcast %1 : vector<1x32xf32> to vector<16x32xf32>
    %c0_1 = arith.constant 0 : index
    %c0_2 = arith.constant 0 : index
    %3 = vector.load %arg1[%c0_1, %c0_2] : memref<16x32xf32, #tpu.memory_space<vmem>>, vector<16x32xf32>
    %c0_3 = arith.constant 0 : index
    %c0_4 = arith.constant 0 : index
    %4 = vector.load %arg2[%c0_3, %c0_4] : memref<32x64xf32, #tpu.memory_space<vmem>>, vector<32x64xf32>
    %cst = arith.constant dense<0.000000e+00> : vector<16x64xf32>
    %5 = tpu.matmul %3, %4, %cst {dimension_numbers = #tpu.dot_dimension_numbers<[1], [0], [0], [1], [0, 0, 1, 1], [], []>} : vector<16x32xf32>, vector<32x64xf32>, vector<16x64xf32> -> vector<16x64xf32>
    %c0_5 = arith.constant 0 : index
    %c0_6 = arith.constant 0 : index
    %6 = vector.load %arg3[%c0_5, %c0_6] : memref<1x64xf32, #tpu.memory_space<vmem>>, vector<1x64xf32>
    %7 = vector.broadcast %6 : vector<1x64xf32> to vector<16x64xf32>
    %8 = arith.addf %5, %7 : vector<16x64xf32>
    %cst_7 = arith.constant 0.000000e+00 : f32
    %9 = vector.broadcast %cst_7 : f32 to vector<16x64xf32>
    %10 = arith.maximumf %8, %9 : vector<16x64xf32>
    %c0_8 = arith.constant 0 : index
    %c0_9 = arith.constant 0 : index
    %11 = vector.load %arg4[%c0_8, %c0_9] : memref<64x32xf32, #tpu.memory_space<vmem>>, vector<64x32xf32>
    %cst_10 = arith.constant dense<0.000000e+00> : vector<16x32xf32>
    %12 = tpu.matmul %10, %11, %cst_10 {dimension_numbers = #tpu.dot_dimension_numbers<[1], [0], [0], [1], [0, 0, 1, 1], [], []>} : vector<16x64xf32>, vector<64x32xf32>, vector<16x32xf32> -> vector<16x32xf32>
    %13 = arith.addf %2, %12 : vector<16x32xf32>
    %c0_11 = arith.constant 0 : index
    %c0_12 = arith.constant 0 : index
    %14 = vector.load %arg6[%c0_11, %c0_12] : memref<16x32xf32, #tpu.memory_space<vmem>>, vector<16x32xf32>
    tpu.vector_store %arg6[%c0_11, %c0_12], %13 {strides = array<i32>} : memref<16x32xf32, #tpu.memory_space<vmem>>, vector<16x32xf32>,
    return
  }
  func.func @transform_0(%arg0: i32) -> (i32, i32) {
    %c0_i32 = arith.constant 0 : i32
    %c0_i32_0 = arith.constant 0 : i32
    return %arg0, %c0_i32 : i32, i32
  }
  func.func @transform_1(%arg0: i32) -> (i32, i32) {
    %c0_i32 = arith.constant 0 : i32
    %c0_i32_0 = arith.constant 0 : i32
    %c0_i32_1 = arith.constant 0 : i32
    return %c0_i32, %c0_i32_0 : i32, i32
  }
  func.func @transform_2(%arg0: i32) -> (i32, i32) {
    %c0_i32 = arith.constant 0 : i32
    %c0_i32_0 = arith.constant 0 : i32
    %c0_i32_1 = arith.constant 0 : i32
    return %c0_i32, %c0_i32_0 : i32, i32
  }
  func.func @transform_3(%arg0: i32) -> (i32, i32) {
    %c0_i32 = arith.constant 0 : i32
    %c0_i32_0 = arith.constant 0 : i32
    %c0_i32_1 = arith.constant 0 : i32
    return %c0_i32, %c0_i32_0 : i32, i32
  }
  func.func @transform_4(%arg0: i32) -> (i32, i32) {
    %c0_i32 = arith.constant 0 : i32
    %c0_i32_0 = arith.constant 0 : i32
    %c0_i32_1 = arith.constant 0 : i32
    return %c0_i32, %c0_i32_0 : i32, i32
  }
  func.func @transform_5(%arg0: i32) -> (i32, i32) {
    %c0_i32 = arith.constant 0 : i32
    %c0_i32_0 = arith.constant 0 : i32
    return %arg0, %c0_i32 : i32, i32
  }
}

</mosaic_0001>

<bundles_post_ra>
// kernel: tpu_custom_call.1
= control target key start
LH: loop header
LB: loop body
LE: loop exit
PB: predicated region body
PF: predicated region fallthrough
CT: control target
= control target key end

     0   :  { %s262_s0 = inlined_call_operand.vmem [shape: f32[16,32], index: 0, kind: input, shape index: {}]   ;;  %s263_s1 = inlined_call_operand.vmem [shape: f32[32,64], index: 1, kind: input, shape index: {}]   ;;  %s264_s2 = inlined_call_operand.vmem [shape: f32[1,64], index: 2, kind: input, shape index: {}]   ;;  %s265_s3 = inlined_call_operand.vmem [shape: f32[64,32], index: 3, kind: input, shape index: {}]   ;;  %s266_s4 = inlined_call_operand.vmem [shape: f32[1,32], index: 4, kind: input, shape index: {}]   ;;  %s267_s5 = inlined_call_operand.hbm [shape: f32[16,32], index: 5, kind: output, shape index: {}]  }
   0x1   :  { %v30_v0 = vld [vmem:[%s263_s1 + $0x18] sm:$0xff]  ;;  %v29_v1 = vld [vmem:[%s263_s1 + $0x10] sm:$0xff]  ;;  %v28_v2 = vld [vmem:[%s263_s1 + $0x8] sm:$0xff] }
   0x2   :  { %131 = vmatpush.msra.mxu3 %v30_v0  ;;  %54 = vmatpush.msra.mxu0 %v30_v0  ;;  %v74_v3 = vld [vmem:[%s265_s3 + $0x38] sm:$0xff]  ;;  %v73_v4 = vld [vmem:[%s265_s3 + $0x30] sm:$0xff]  ;;  %v27_v5 = vld [vmem:[%s263_s1] sm:$0xff] }
   0x3   :  { %135 = vmatpush.msra.mxu2 %v74_v3  ;;  %90 = vmatpush.msra.mxu1 %v74_v3 }
   0x4   :  { %132 = vmatpush.msra.mxu3 %v29_v1  ;;  %55 = vmatpush.msra.mxu0 %v29_v1 }
   0x5   :  { %10 = vsyncpa [#allocation3], 0  ;;  %v26_v6 = vld [vmem:[%s262_s0 + $0x8] sm:$0xff]  ;;  %vm35_vm0 = vcmask 261120   ;;  %v25_v7 = vld [vmem:[%s262_s0] sm:$0xff]  ;;  %136 = vmatpush.msra.mxu2 %v73_v4  ;;  %91 = vmatpush.msra.mxu1 %v73_v4  ;;  %vm75_vm1 = vcmask 523264  }
   0x6   :  { %133 = vmatpush.msra.mxu3 %v28_v2  ;;  %56 = vmatpush.msra.mxu0 %v28_v2  ;;  %v72_v8 = vld [vmem:[%s265_s3 + $0x28] sm:$0xff]  ;;  %v71_v9 = vld [vmem:[%s265_s3 + $0x20] sm:$0xff]  ;;  %v70_v10 = vld [vmem:[%s265_s3 + $0x18] sm:$0xff]  ;;  %s115_s25 = sshll.u32 %s267_s5, 4  ;;  %s175_s26 = smov 128   ;;  %s116_s25 = int_to_ptr.hbm [resolvable:$true] %s115_s25 }
   0x7   :  { %137 = vmatpush.msra.mxu2 %v72_v8  ;;  %92 = vmatpush.msra.mxu1 %v72_v8  ;;  %v69_v11 = vld [vmem:[%s265_s3 + $0x10] sm:$0xff]  ;;  %v68_v12 = vld [vmem:[%s265_s3 + $0x8] sm:$0xff]  ;;  %v67_v13 = vld [vmem:[%s265_s3] sm:$0xff]  ;;  %s174_s3 = smov [#allocation2]   ;;  %s176_s27 = smov 8  }
   0x8   :  { %134 = vmatpush.msra.mxu3 %v27_v5  ;;  %57 = vmatpush.msra.mxu0 %v27_v5  ;;  %v146_v14 = vld [vmem:[%s264_s2] ss:$0 sm:$0xff]  ;;  %s113_s23 = sshll.u32 %s174_s3, 4  ;;  %s114_s23 = int_to_ptr.vmem [resolvable:$true] %s113_s23 }
   0x9   :  { %128 = vmatmul.msk.f32.vlgmr.msra.gmra.mxu3 %vm35_vm0, %v26_v6  ;;  %127 = vmatmul.msk.f32.vlgmr.msra.gmra.mxu0 %vm35_vm0, %v25_v7  ;;  %v147_v21 = vld [vmem:[%s266_s4] ss:$0 sm:$0xff] }
   0xa   :  { %138 = vmatpush.msra.mxu2 %v71_v9  ;;  %93 = vmatpush.msra.mxu1 %v71_v9 }
   0xc   :  { %139 = vmatpush.msra.mxu2 %v70_v10  ;;  %94 = vmatpush.msra.mxu1 %v70_v10 }
   0xe   :  { %140 = vmatpush.msra.mxu2 %v69_v11  ;;  %95 = vmatpush.msra.mxu1 %v69_v11 }
  0x10   :  { %141 = vmatpush.msra.mxu2 %v68_v12  ;;  %96 = vmatpush.msra.mxu1 %v68_v12 }
  0x12   :  { %142 = vmatpush.msra.mxu2 %v67_v13  ;;  %97 = vmatpush.msra.mxu1 %v67_v13 }
  0x86   :  { %v59_v15 = vpop.f32.mrf.mxu0 }
  0x87   :  { %v60_v16 = vadd.f32 %v146_v14, %v59_v15 }
  0x89   :  { %v65_v17 = vmax.f32 %v60_v16, 0.0 }
  0x8b   :  { %129 = vmatmul.msk.f32.vlgmr.msra.gmra.mxu1 %vm75_vm1, %v65_v17 }
  0x8c   :  { %v62_v18 = vpop.f32.mrf.mxu3 }
  0x8d   :  { %v63_v19 = vadd.f32 %v146_v14, %v62_v18 }
  0x8f   :  { %v66_v20 = vmax.f32 %v63_v19, 0.0 }
  0x91   :  { %130 = vmatmul.msk.f32.vlgmr.msra.gmra.mxu2 %vm75_vm1, %v66_v20 }
 0x108   :  { %v99_v22 = vpop.f32.mrf.mxu1 }
 0x109   :  { %v105_v23 = vadd.f32 %v147_v21, %v99_v22 }
 0x10b   :  { %107 = vst.msk [vmem:[#allocation2] sm:$0xff] %vm35_vm0, %v105_v23 }
 0x114   :  { %v102_v24 = vpop.f32.mrf.mxu2 }
 0x115   :  { %v106_v25 = vadd.f32 %v147_v21, %v102_v24 }
 0x117   :  { %108 = vst.msk [vmem:[#allocation2 + $0x8] sm:$0xff] %vm35_vm0, %v106_v25 }
 0x118   :  { %121 = dma.vmem_to_hbm [thread:$0]  %s114_s23, 256, %s116_s25, [#allocation3], %s175_s26, %s175_s26, %s176_s27  }
 0x119   :  { %172 = dma.done.wait [#allocation3], 256  }
 0x11a   :  { %173 = vsyncadd [#allocation3], 4294967040 }
 0x11b   :  { %126 = vsyncpa [#allocation3], 1 }

</bundles_post_ra>
